<compile_context>
chip_gen: v7x
topology: tpu7x:2x2x1
jax: 0.10.0
libtpu: 0.0.40
codegen_flags: <defaults>
</compile_context>

<pallas_src>
import math

import jax
import jax.numpy as jnp
from jax import lax
from jax.experimental import pallas as pl
from jax.experimental.pallas import tpu as pltpu

ENCODER_REGULAR_VTH = 0.999


def _round_up(x, m):
    return ((x + m - 1) // m) * m


def _encoder_kernel(obs_ref, mean_ref, std_ref, out_ref, act_ref, volt_ref):
    """One (tT, tb, tn) output chunk of the regular spike train.

    obs_ref : (tb, tn)      observation broadcast over the population dim
    mean_ref: (1, tn)       per-neuron mean
    std_ref : (1, tn)       per-neuron std
    out_ref : (tT, tb, tn)  spike-train chunk, time-major, lane-dense in tn
    act_ref : (tb, tn)      VMEM scratch: cached Gaussian population activation
    volt_ref: (tb, tn)      VMEM scratch: membrane potential across time chunks
    """
    t = pl.program_id(2)

    # First time chunk for this (batch, neuron) tile: compute the population
    # activation once and reset the membrane potential.
    @pl.when(t == 0)
    def _():
        std = std_ref[...]
        scale = -0.5 / (std * std)              # (1, tn): one exact divide / neuron
        diff = obs_ref[...] - mean_ref[...]
        act_ref[...] = jnp.exp(diff * diff * scale)
        volt_ref[...] = jnp.zeros_like(volt_ref)

    pop_act = act_ref[...]
    n_steps = out_ref.shape[0]

    # Membrane potential lives in vregs as the loop carry within a chunk; the
    # only per-step store is the spike tile. Fully unroll short spike trains,
    # bounded unroll for long ones to keep vreg live ranges in check.
    def body(step, volt):
        v = volt + pop_act
        spike = (v > ENCODER_REGULAR_VTH).astype(out_ref.dtype)
        out_ref[step] = spike
        return v - spike * ENCODER_REGULAR_VTH

    volt_ref[...] = lax.fori_loop(
        0, n_steps, body, volt_ref[...],
        unroll=True if n_steps <= 16 else 8)


def pop_spike_encoder_regular_spike(obs, mean, std, pop_dim, spike_ts,
                                    *, time_major_output=False):
    """
    obs:  (B, obs_dim) float32
    mean: (1, obs_dim, pop_dim) float32  (learnable param)
    std:  (1, obs_dim, pop_dim) float32  (learnable param)
    returns: pop_spikes (B, obs_dim*pop_dim, spike_ts) float32
             (or (spike_ts, B, obs_dim*pop_dim) if time_major_output=True).
    """
    obs = jnp.asarray(obs, jnp.float32)
    obs = obs.reshape(-1, mean.shape[1])          # mirrors obs.view(-1, obs_dim, 1)
    B, obs_dim = obs.shape
    N = obs_dim * pop_dim

    # Lane/sublane-dense padded extents.
    N_pad = _round_up(N, 128)
    B_pad = _round_up(B, 8)

    # Tile choice: largest tiles that divide the padded extents.
    tn = 128
    for cand in (512, 256, 128):
        if N_pad % cand == 0:
            tn = cand
            break
    tb = 8
    for cand in (64, 32, 16, 8):
        if B_pad % cand == 0:
            tb = cand
            break

    # Time-chunk size bounded by a conservative VMEM budget (fits v7x's smaller
    # VMEM; the double-buffered output chunk dominates).
    vmem_budget = 12 * 1024 * 1024
    fixed_bytes = 4 * (2 * tb * tn        # obs block (double-buffered)
                       + 4 * tn           # mean/std rows (double-buffered)
                       + 2 * tb * tn)     # act + volt scratch
    per_step_bytes = 2 * 4 * tb * tn      # double-buffered fp32 output, per step
    tT = int(max(1, min(spike_ts, (vmem_budget - fixed_bytes) // per_step_bytes)))
    T_pad = _round_up(spike_ts, tT)

    # Glue: broadcast obs over the population dim, flatten params, pad.
    obs_bn = jnp.broadcast_to(obs[:, :, None], (B, obs_dim, pop_dim))
    obs_bn = obs_bn.reshape(B, N)
    obs_bn = jnp.pad(obs_bn, ((0, B_pad - B), (0, N_pad - N)))
    mean_2d = jnp.pad(mean.reshape(1, N).astype(jnp.float32),
                      ((0, 0), (0, N_pad - N)))
    # Pad std with 1.0 so padded lanes never divide by zero.
    std_2d = jnp.pad(std.reshape(1, N).astype(jnp.float32),
                     ((0, 0), (0, N_pad - N)), constant_values=1.0)

    spikes_tbn = pl.pallas_call(
        _encoder_kernel,
        out_shape=jax.ShapeDtypeStruct((T_pad, B_pad, N_pad), jnp.float32),
        grid_spec=pltpu.PrefetchScalarGridSpec(
            num_scalar_prefetch=0,
            grid=(B_pad // tb, N_pad // tn, T_pad // tT),
            in_specs=[
                pl.BlockSpec((tb, tn), lambda i, j, t: (i, j)),
                pl.BlockSpec((1, tn), lambda i, j, t: (0, j)),
                pl.BlockSpec((1, tn), lambda i, j, t: (0, j)),
            ],
            out_specs=pl.BlockSpec((tT, tb, tn), lambda i, j, t: (t, i, j)),
            scratch_shapes=[
                pltpu.VMEM((tb, tn), jnp.float32),   # pop_act cache
                pltpu.VMEM((tb, tn), jnp.float32),   # membrane potential
            ]),
        compiler_params=pltpu.CompilerParams(
            dimension_semantics=("parallel", "parallel", "arbitrary")),
    )(obs_bn, mean_2d, std_2d)

    spikes_tbn = spikes_tbn[:spike_ts, :B, :N]
    if time_major_output:
        # Natural kernel layout; no relayout HBM traffic.
        return spikes_tbn
    # PyTorch layout (B, N, T). Consumers that can accept time-major should
    # pass time_major_output=True to skip this transpose.
    return jnp.transpose(spikes_tbn, (1, 2, 0))


def _reference(obs, mean, std, pop_dim, spike_ts):
    """Pure-JAX reference mirroring the PyTorch forward."""
    B, obs_dim = obs.shape
    N = obs_dim * pop_dim
    obs3 = obs.reshape(B, obs_dim, 1)
    pop_act = jnp.exp(-0.5 * (obs3 - mean) ** 2 / (std ** 2)).reshape(B, N)
    volt = jnp.zeros((B, N), jnp.float32)
    spikes = []
    for _ in range(spike_ts):
        volt = volt + pop_act
        s = (volt > ENCODER_REGULAR_VTH).astype(jnp.float32)
        spikes.append(s)
        volt = volt - s * ENCODER_REGULAR_VTH
    return jnp.stack(spikes, axis=-1)


if __name__ == "__main__":
    # Module hyperparameters (small, consistent with the PyTorch __init__).
    obs_dim = 4
    pop_dim = 16
    spike_ts = 8
    mean_range = (-3.0, 3.0)
    std_val = math.sqrt(0.15)
    batch_size = 2

    # Deterministic parameter initialization (as in __init__).
    delta_mean = (mean_range[1] - mean_range[0]) / (pop_dim - 1)
    mean_param = mean_range[0] + delta_mean * jnp.arange(pop_dim, dtype=jnp.float32)
    mean_param = jnp.broadcast_to(mean_param[None, None, :], (1, obs_dim, pop_dim))
    std_param = jnp.full((1, obs_dim, pop_dim), std_val, dtype=jnp.float32)

    # Deterministic example input.
    key = jax.random.PRNGKey(0)
    obs = jax.random.uniform(key, (batch_size, obs_dim), dtype=jnp.float32,
                             minval=-3.0, maxval=3.0)

    out = pop_spike_encoder_regular_spike(obs, mean_param, std_param,
                                          pop_dim, spike_ts)
    out = jax.block_until_ready(out)

    ref = _reference(obs, mean_param, std_param, pop_dim, spike_ts)
    assert out.shape == (batch_size, obs_dim * pop_dim, spike_ts)
    assert jnp.allclose(out, ref, atol=1e-5), "mismatch vs reference"

    # TODO(synk): surrogate gradient (PseudoEncoderSpikeRegular.backward) is
    # training-only and intentionally not part of this forward kernel.
    print("KERNEL_OK")
</pallas_src>

<mosaic_0001>
module attributes {stable_mosaic.version = 11 : i64} {
  func.func @_encoder_kernel(%arg0: i32, %arg1: i32, %arg2: i32, %arg3: memref<8x128xf32, #tpu.memory_space<vmem>>, %arg4: memref<1x128xf32, #tpu.memory_space<vmem>>, %arg5: memref<1x128xf32, #tpu.memory_space<vmem>>, %arg6: memref<8x8x128xf32, #tpu.memory_space<vmem>>, %arg7: memref<8x128xf32, #tpu.memory_space<vmem>>, %arg8: memref<8x128xf32, #tpu.memory_space<vmem>>) attributes {dimension_semantics = [#tpu.dimension_semantics<parallel>, #tpu.dimension_semantics<parallel>, #tpu.dimension_semantics<arbitrary>], iteration_bounds = array<i64: 1, 1, 1>, scalar_prefetch = 0 : i64, scratch_operands = 2 : i64, tpu.core_type = #tpu.core_type<tc>, window_params = [{transform_indices = @transform_0, window_bounds = array<i64: 8, 128>}, {transform_indices = @transform_1, window_bounds = array<i64: 1, 128>}, {transform_indices = @transform_2, window_bounds = array<i64: 1, 128>}, {transform_indices = @transform_3, window_bounds = array<i64: 8, 8, 128>}]} {
    %c0_i32 = arith.constant 0 : i32
    %0 = arith.cmpi eq, %arg2, %c0_i32 : i32
    %1 = arith.extui %0 : i1 to i32
    %c0_i32_0 = arith.constant 0 : i32
    %2 = arith.cmpi ne, %1, %c0_i32_0 : i32
    scf.if %2 {
      %c0_38 = arith.constant 0 : index
      %c0_39 = arith.constant 0 : index
      %102 = vector.load %arg5[%c0_38, %c0_39] : memref<1x128xf32, #tpu.memory_space<vmem>>, vector<1x128xf32>
      %103 = arith.mulf %102, %102 : vector<1x128xf32>
      %cst_40 = arith.constant -5.000000e-01 : f32
      %104 = vector.broadcast %cst_40 : f32 to vector<1x128xf32>
      %105 = arith.divf %104, %103 : vector<1x128xf32>
      %c0_41 = arith.constant 0 : index
      %c0_42 = arith.constant 0 : index
      %106 = vector.load %arg3[%c0_41, %c0_42] : memref<8x128xf32, #tpu.memory_space<vmem>>, vector<8x128xf32>
      %c0_43 = arith.constant 0 : index
      %c0_44 = arith.constant 0 : index
      %107 = vector.load %arg4[%c0_43, %c0_44] : memref<1x128xf32, #tpu.memory_space<vmem>>, vector<1x128xf32>
      %108 = vector.broadcast %107 : vector<1x128xf32> to vector<8x128xf32>
      %109 = arith.subf %106, %108 : vector<8x128xf32>
      %110 = arith.mulf %109, %109 : vector<8x128xf32>
      %111 = vector.broadcast %105 : vector<1x128xf32> to vector<8x128xf32>
      %112 = arith.mulf %110, %111 : vector<8x128xf32>
      %113 = math.exp %112 : vector<8x128xf32>
      %c0_45 = arith.constant 0 : index
      %c0_46 = arith.constant 0 : index
      %114 = vector.load %arg7[%c0_45, %c0_46] : memref<8x128xf32, #tpu.memory_space<vmem>>, vector<8x128xf32>
      tpu.vector_store %arg7[%c0_45, %c0_46], %113 {strides = array<i32>} : memref<8x128xf32, #tpu.memory_space<vmem>>, vector<8x128xf32>,
      %cst_47 = arith.constant 0.000000e+00 : f32
      %115 = vector.broadcast %cst_47 : f32 to vector<8x128xf32>
      %c0_48 = arith.constant 0 : index
      %c0_49 = arith.constant 0 : index
      %116 = vector.load %arg8[%c0_48, %c0_49] : memref<8x128xf32, #tpu.memory_space<vmem>>, vector<8x128xf32>
      tpu.vector_store %arg8[%c0_48, %c0_49], %115 {strides = array<i32>} : memref<8x128xf32, #tpu.memory_space<vmem>>, vector<8x128xf32>,
    } else {
    }
    %c0 = arith.constant 0 : index
    %c0_1 = arith.constant 0 : index
    %3 = vector.load %arg7[%c0, %c0_1] : memref<8x128xf32, #tpu.memory_space<vmem>>, vector<8x128xf32>
    %c0_2 = arith.constant 0 : index
    %c0_3 = arith.constant 0 : index
    %4 = vector.load %arg8[%c0_2, %c0_3] : memref<8x128xf32, #tpu.memory_space<vmem>>, vector<8x128xf32>
    %c0_i32_4 = arith.constant 0 : i32
    %5 = arith.addf %4, %3 : vector<8x128xf32>
    %cst = arith.constant 9.990000e-01 : f32
    %6 = vector.broadcast %cst : f32 to vector<8x128xf32>
    %7 = arith.cmpf ogt, %5, %6 : vector<8x128xf32>
    %8 = arith.extui %7 : vector<8x128xi1> to vector<8x128xi32>
    %9 = arith.sitofp %8 : vector<8x128xi32> to vector<8x128xf32>
    %10 = arith.index_cast %c0_i32_4 : i32 to index
    %c0_5 = arith.constant 0 : index
    %c0_6 = arith.constant 0 : index
    %11 = vector.load %arg6[%10, %c0_5, %c0_6] : memref<8x8x128xf32, #tpu.memory_space<vmem>>, vector<1x8x128xf32>
    %12 = vector.shape_cast %11 : vector<1x8x128xf32> to vector<8x128xf32>
    %13 = vector.shape_cast %9 : vector<8x128xf32> to vector<1x8x128xf32>
    tpu.vector_store %arg6[%10, %c0_5, %c0_6], %13 {strides = array<i32>} : memref<8x8x128xf32, #tpu.memory_space<vmem>>, vector<1x8x128xf32>,
    %cst_7 = arith.constant 9.990000e-01 : f32
    %14 = vector.broadcast %cst_7 : f32 to vector<8x128xf32>
    %15 = arith.mulf %9, %14 : vector<8x128xf32>
    %16 = arith.subf %5, %15 : vector<8x128xf32>
    %c1_i32 = arith.constant 1 : i32
    %17 = arith.addf %16, %3 : vector<8x128xf32>
    %cst_8 = arith.constant 9.990000e-01 : f32
    %18 = vector.broadcast %cst_8 : f32 to vector<8x128xf32>
    %19 = arith.cmpf ogt, %17, %18 : vector<8x128xf32>
    %20 = arith.extui %19 : vector<8x128xi1> to vector<8x128xi32>
    %21 = arith.sitofp %20 : vector<8x128xi32> to vector<8x128xf32>
    %22 = arith.index_cast %c1_i32 : i32 to index
    %c0_9 = arith.constant 0 : index
    %c0_10 = arith.constant 0 : index
    %23 = vector.load %arg6[%22, %c0_9, %c0_10] : memref<8x8x128xf32, #tpu.memory_space<vmem>>, vector<1x8x128xf32>
    %24 = vector.shape_cast %23 : vector<1x8x128xf32> to vector<8x128xf32>
    %25 = vector.shape_cast %21 : vector<8x128xf32> to vector<1x8x128xf32>
    tpu.vector_store %arg6[%22, %c0_9, %c0_10], %25 {strides = array<i32>} : memref<8x8x128xf32, #tpu.memory_space<vmem>>, vector<1x8x128xf32>,
    %cst_11 = arith.constant 9.990000e-01 : f32
    %26 = vector.broadcast %cst_11 : f32 to vector<8x128xf32>
    %27 = arith.mulf %21, %26 : vector<8x128xf32>
    %28 = arith.subf %17, %27 : vector<8x128xf32>
    %c2_i32 = arith.constant 2 : i32
    %29 = arith.addf %28, %3 : vector<8x128xf32>
    %cst_12 = arith.constant 9.990000e-01 : f32
    %30 = vector.broadcast %cst_12 : f32 to vector<8x128xf32>
    %31 = arith.cmpf ogt, %29, %30 : vector<8x128xf32>
    %32 = arith.extui %31 : vector<8x128xi1> to vector<8x128xi32>
    %33 = arith.sitofp %32 : vector<8x128xi32> to vector<8x128xf32>
    %34 = arith.index_cast %c2_i32 : i32 to index
    %c0_13 = arith.constant 0 : index
    %c0_14 = arith.constant 0 : index
    %35 = vector.load %arg6[%34, %c0_13, %c0_14] : memref<8x8x128xf32, #tpu.memory_space<vmem>>, vector<1x8x128xf32>
    %36 = vector.shape_cast %35 : vector<1x8x128xf32> to vector<8x128xf32>
    %37 = vector.shape_cast %33 : vector<8x128xf32> to vector<1x8x128xf32>
    tpu.vector_store %arg6[%34, %c0_13, %c0_14], %37 {strides = array<i32>} : memref<8x8x128xf32, #tpu.memory_space<vmem>>, vector<1x8x128xf32>,
    %cst_15 = arith.constant 9.990000e-01 : f32
    %38 = vector.broadcast %cst_15 : f32 to vector<8x128xf32>
    %39 = arith.mulf %33, %38 : vector<8x128xf32>
    %40 = arith.subf %29, %39 : vector<8x128xf32>
    %c3_i32 = arith.constant 3 : i32
    %41 = arith.addf %40, %3 : vector<8x128xf32>
    %cst_16 = arith.constant 9.990000e-01 : f32
    %42 = vector.broadcast %cst_16 : f32 to vector<8x128xf32>
    %43 = arith.cmpf ogt, %41, %42 : vector<8x128xf32>
    %44 = arith.extui %43 : vector<8x128xi1> to vector<8x128xi32>
    %45 = arith.sitofp %44 : vector<8x128xi32> to vector<8x128xf32>
    %46 = arith.index_cast %c3_i32 : i32 to index
    %c0_17 = arith.constant 0 : index
    %c0_18 = arith.constant 0 : index
    %47 = vector.load %arg6[%46, %c0_17, %c0_18] : memref<8x8x128xf32, #tpu.memory_space<vmem>>, vector<1x8x128xf32>
    %48 = vector.shape_cast %47 : vector<1x8x128xf32> to vector<8x128xf32>
    %49 = vector.shape_cast %45 : vector<8x128xf32> to vector<1x8x128xf32>
    tpu.vector_store %arg6[%46, %c0_17, %c0_18], %49 {strides = array<i32>} : memref<8x8x128xf32, #tpu.memory_space<vmem>>, vector<1x8x128xf32>,
    %cst_19 = arith.constant 9.990000e-01 : f32
    %50 = vector.broadcast %cst_19 : f32 to vector<8x128xf32>
    %51 = arith.mulf %45, %50 : vector<8x128xf32>
    %52 = arith.subf %41, %51 : vector<8x128xf32>
    %c4_i32 = arith.constant 4 : i32
    %53 = arith.addf %52, %3 : vector<8x128xf32>
    %cst_20 = arith.constant 9.990000e-01 : f32
    %54 = vector.broadcast %cst_20 : f32 to vector<8x128xf32>
    %55 = arith.cmpf ogt, %53, %54 : vector<8x128xf32>
    %56 = arith.extui %55 : vector<8x128xi1> to vector<8x128xi32>
    %57 = arith.sitofp %56 : vector<8x128xi32> to vector<8x128xf32>
    %58 = arith.index_cast %c4_i32 : i32 to index
    %c0_21 = arith.constant 0 : index
    %c0_22 = arith.constant 0 : index
    %59 = vector.load %arg6[%58, %c0_21, %c0_22] : memref<8x8x128xf32, #tpu.memory_space<vmem>>, vector<1x8x128xf32>
    %60 = vector.shape_cast %59 : vector<1x8x128xf32> to vector<8x128xf32>
    %61 = vector.shape_cast %57 : vector<8x128xf32> to vector<1x8x128xf32>
    tpu.vector_store %arg6[%58, %c0_21, %c0_22], %61 {strides = array<i32>} : memref<8x8x128xf32, #tpu.memory_space<vmem>>, vector<1x8x128xf32>,
    %cst_23 = arith.constant 9.990000e-01 : f32
    %62 = vector.broadcast %cst_23 : f32 to vector<8x128xf32>
    %63 = arith.mulf %57, %62 : vector<8x128xf32>
    %64 = arith.subf %53, %63 : vector<8x128xf32>
    %c5_i32 = arith.constant 5 : i32
    %65 = arith.addf %64, %3 : vector<8x128xf32>
    %cst_24 = arith.constant 9.990000e-01 : f32
    %66 = vector.broadcast %cst_24 : f32 to vector<8x128xf32>
    %67 = arith.cmpf ogt, %65, %66 : vector<8x128xf32>
    %68 = arith.extui %67 : vector<8x128xi1> to vector<8x128xi32>
    %69 = arith.sitofp %68 : vector<8x128xi32> to vector<8x128xf32>
    %70 = arith.index_cast %c5_i32 : i32 to index
    %c0_25 = arith.constant 0 : index
    %c0_26 = arith.constant 0 : index
    %71 = vector.load %arg6[%70, %c0_25, %c0_26] : memref<8x8x128xf32, #tpu.memory_space<vmem>>, vector<1x8x128xf32>
    %72 = vector.shape_cast %71 : vector<1x8x128xf32> to vector<8x128xf32>
    %73 = vector.shape_cast %69 : vector<8x128xf32> to vector<1x8x128xf32>
    tpu.vector_store %arg6[%70, %c0_25, %c0_26], %73 {strides = array<i32>} : memref<8x8x128xf32, #tpu.memory_space<vmem>>, vector<1x8x128xf32>,
    %cst_27 = arith.constant 9.990000e-01 : f32
    %74 = vector.broadcast %cst_27 : f32 to vector<8x128xf32>
    %75 = arith.mulf %69, %74 : vector<8x128xf32>
    %76 = arith.subf %65, %75 : vector<8x128xf32>
    %c6_i32 = arith.constant 6 : i32
    %77 = arith.addf %76, %3 : vector<8x128xf32>
    %cst_28 = arith.constant 9.990000e-01 : f32
    %78 = vector.broadcast %cst_28 : f32 to vector<8x128xf32>
    %79 = arith.cmpf ogt, %77, %78 : vector<8x128xf32>
    %80 = arith.extui %79 : vector<8x128xi1> to vector<8x128xi32>
    %81 = arith.sitofp %80 : vector<8x128xi32> to vector<8x128xf32>
    %82 = arith.index_cast %c6_i32 : i32 to index
    %c0_29 = arith.constant 0 : index
    %c0_30 = arith.constant 0 : index
    %83 = vector.load %arg6[%82, %c0_29, %c0_30] : memref<8x8x128xf32, #tpu.memory_space<vmem>>, vector<1x8x128xf32>
    %84 = vector.shape_cast %83 : vector<1x8x128xf32> to vector<8x128xf32>
    %85 = vector.shape_cast %81 : vector<8x128xf32> to vector<1x8x128xf32>
    tpu.vector_store %arg6[%82, %c0_29, %c0_30], %85 {strides = array<i32>} : memref<8x8x128xf32, #tpu.memory_space<vmem>>, vector<1x8x128xf32>,
    %cst_31 = arith.constant 9.990000e-01 : f32
    %86 = vector.broadcast %cst_31 : f32 to vector<8x128xf32>
    %87 = arith.mulf %81, %86 : vector<8x128xf32>
    %88 = arith.subf %77, %87 : vector<8x128xf32>
    %c7_i32 = arith.constant 7 : i32
    %89 = arith.addf %88, %3 : vector<8x128xf32>
    %cst_32 = arith.constant 9.990000e-01 : f32
    %90 = vector.broadcast %cst_32 : f32 to vector<8x128xf32>
    %91 = arith.cmpf ogt, %89, %90 : vector<8x128xf32>
    %92 = arith.extui %91 : vector<8x128xi1> to vector<8x128xi32>
    %93 = arith.sitofp %92 : vector<8x128xi32> to vector<8x128xf32>
    %94 = arith.index_cast %c7_i32 : i32 to index
    %c0_33 = arith.constant 0 : index
    %c0_34 = arith.constant 0 : index
    %95 = vector.load %arg6[%94, %c0_33, %c0_34] : memref<8x8x128xf32, #tpu.memory_space<vmem>>, vector<1x8x128xf32>
    %96 = vector.shape_cast %95 : vector<1x8x128xf32> to vector<8x128xf32>
    %97 = vector.shape_cast %93 : vector<8x128xf32> to vector<1x8x128xf32>
    tpu.vector_store %arg6[%94, %c0_33, %c0_34], %97 {strides = array<i32>} : memref<8x8x128xf32, #tpu.memory_space<vmem>>, vector<1x8x128xf32>,
    %cst_35 = arith.constant 9.990000e-01 : f32
    %98 = vector.broadcast %cst_35 : f32 to vector<8x128xf32>
    %99 = arith.mulf %93, %98 : vector<8x128xf32>
    %100 = arith.subf %89, %99 : vector<8x128xf32>
    %c8_i32 = arith.constant 8 : i32
    %c0_36 = arith.constant 0 : index
    %c0_37 = arith.constant 0 : index
    %101 = vector.load %arg8[%c0_36, %c0_37] : memref<8x128xf32, #tpu.memory_space<vmem>>, vector<8x128xf32>
    tpu.vector_store %arg8[%c0_36, %c0_37], %100 {strides = array<i32>} : memref<8x128xf32, #tpu.memory_space<vmem>>, vector<8x128xf32>,
    return
  }
  func.func @transform_0(%arg0: i32, %arg1: i32, %arg2: i32) -> (i32, i32) {
    %c0_i32 = arith.constant 0 : i32
    return %arg0, %arg1 : i32, i32
  }
  func.func @transform_1(%arg0: i32, %arg1: i32, %arg2: i32) -> (i32, i32) {
    %c0_i32 = arith.constant 0 : i32
    %c0_i32_0 = arith.constant 0 : i32
    return %c0_i32, %arg1 : i32, i32
  }
  func.func @transform_2(%arg0: i32, %arg1: i32, %arg2: i32) -> (i32, i32) {
    %c0_i32 = arith.constant 0 : i32
    %c0_i32_0 = arith.constant 0 : i32
    return %c0_i32, %arg1 : i32, i32
  }
  func.func @transform_3(%arg0: i32, %arg1: i32, %arg2: i32) -> (i32, i32, i32) {
    %c0_i32 = arith.constant 0 : i32
    return %arg2, %arg0, %arg1 : i32, i32, i32
  }
}

</mosaic_0001>

<bundles_post_ra>
// kernel: tpu_custom_call.1
= control target key start
LH: loop header
LB: loop body
LE: loop exit
PB: predicated region body
PF: predicated region fallthrough
CT: control target
= control target key end

     0   :  { %8 = vsyncpa [#allocation5], 0  ;;  %s260_s0 = inlined_call_operand.hbm [shape: f32[8,128], index: 0, kind: input, shape index: {}]   ;;  %s261_s1 = inlined_call_operand.vmem [shape: f32[1,128], index: 1, kind: input, shape index: {}]   ;;  %s262_s2 = inlined_call_operand.vmem [shape: f32[1,128], index: 2, kind: input, shape index: {}]   ;;  %s263_s3 = inlined_call_operand.hbm [shape: f32[8,8,128], index: 3, kind: output, shape index: {}]  }
   0x1   :  { %9 = vsyncpa [#allocation6], 0  ;;  %s205_s12 = smov [#allocation4]   ;;  %s157_s16 = scalar_lea.hbm %s260_s0, 128 }
   0x2   :  { %s16_s13 = sshll.u32 %s205_s12, 4  ;;  %p158_p0 = scmp.ne.s32.totalorder %s260_s0, %s157_s16  ;;  %s17_s13 = int_to_ptr.vmem [resolvable:$true] %s16_s13 }
   0x3   :  { %p161_p1 = scmp.lt.u32.totalorder %s157_s16, %s260_s0 }
   0x5   :  { %p163_p2 = pnand %p161_p1, %p158_p0 }
   0x7   :  { %166 = shalt.err (!%p163_p2)
}
   0x8   :  { %s167_s21 = scalar_lea.vmem %s17_s13, 128  ;;  %p172_p4 = scmp.lt.s32.totalorder %s17_s13, %s17_s13 }
   0x9   :  { %p168_p3 = scmp.ne.s32.totalorder %s17_s13, %s167_s21  ;;  %p173_p5 = scmp.lt.s32.totalorder %s167_s21, %s167_s21 }
   0xb   :  { %p174_p6 = por %p173_p5, %p172_p4 }
   0xd   :  { %p175_p7 = pnand %p174_p6, %p168_p3 }
   0xf   :  { %178 = shalt.err (!%p175_p7)
}
  0x10   :  { %19 = dma.hbm_to_vmem [thread:$0]  %s260_s0, 128, %s17_s13, [#allocation5]  }
  0x11   :  { %201 = dma.done.wait [#allocation5], 128  }
  0x12   :  { %202 = vsyncadd [#allocation5], 4294967168  ;;  %v31_v0 = vld [vmem:[%s262_s2] sm:$0x1]  ;;  %v46_v2 = vlaneseq  ;;  %v206_v15 = vmov 0.0   ;;  %s207_s0 = smov [#allocation7]  }
  0x13   :  { %v32_v1 = vmul.f32 %v31_v0, %v31_v0  ;;  %v35_v3 = vld [vmem:[#allocation4] sm:$0xff] }
  0x14   :  { %v139_v4 = vld [vmem:[%s261_s1] ss:$0 sm:$0xff]  ;;  %v47_v5 = vshrl.u32 %v46_v2, 7  ;;  %s127_s1 = sshll.u32 %s207_s0, 4  ;;  %s128_s1 = int_to_ptr.vmem [resolvable:$true] %s127_s1 }
  0x15   :  { %153 = vrcp.f32 %v32_v1  ;;  %v43_v6 = vsub.f32 %v35_v3, %v139_v4  ;;  %s179_s2 = scalar_lea.vmem %s128_s1, 1024  ;;  %p184_p9 = scmp.lt.s32.totalorder %s128_s1, %s128_s1 }
  0x16   :  { %v48_v7 = vsub.s32 0, %v47_v5  ;;  %p180_p8 = scmp.ne.s32.totalorder %s128_s1, %s179_s2  ;;  %p185_p10 = scmp.lt.s32.totalorder %s179_s2, %s179_s2 }
  0x17   :  { %v44_v10 = vmul.f32 %v43_v6, %v43_v6 }
  0x18   :  { %p186_p11 = por %p185_p10, %p184_p9 }
  0x1a   :  { %p187_p12 = pnand %p186_p11, %p180_p8 }
  0x1f   :  { %v154_v8 = vpop.eup %153 }
  0x20   :  { %v34_v9 = vmul.f32 -0.5, %v154_v8 }
  0x22   :  { %v49_v11 = vrot.slane %v34_v9, %v48_v7 }
  0x24   :  { %v51_v12 = vmul.f32 %v49_v11, %v44_v10 }
  0x26   :  { %v52_v13 = vmul.f32 1.442695, %v51_v12 }
  0x28   :  { %155 = vpow2.f32 %v52_v13 }
  0x32   :  { %v156_v14 = vpop.eup %155 }
  0x33   :  { %vm59_vm0 = vcmp.gt.f32.partialorder %v156_v14, 0.999 }
  0x34   :  { %v140_v16 = vsel %vm59_vm0, 1.0, %v206_v15 }
  0x35   :  { %62 = vst [vmem:[#allocation7] sm:$0xff] %v140_v16  ;;  %v63_v17 = vmul.f32 0.999, %v140_v16 }
  0x37   :  { %v64_v18 = vsub.f32 %v156_v14, %v63_v17 }
  0x39   :  { %v65_v19 = vadd.f32 %v156_v14, %v64_v18 }
  0x3b   :  { %vm66_vm1 = vcmp.gt.f32.partialorder %v65_v19, 0.999 }
  0x3c   :  { %v141_v20 = vsel %vm66_vm1, 1.0, %v206_v15 }
  0x3d   :  { %70 = vst [vmem:[#allocation7 + $0x8] sm:$0xff] %v141_v20  ;;  %v71_v21 = vmul.f32 0.999, %v141_v20 }
  0x3f   :  { %v72_v22 = vsub.f32 %v65_v19, %v71_v21 }
  0x41   :  { %v73_v23 = vadd.f32 %v156_v14, %v72_v22 }
  0x43   :  { %vm74_vm2 = vcmp.gt.f32.partialorder %v73_v23, 0.999 }
  0x44   :  { %v142_v24 = vsel %vm74_vm2, 1.0, %v206_v15 }
  0x45   :  { %78 = vst [vmem:[#allocation7 + $0x10] sm:$0xff] %v142_v24  ;;  %v79_v25 = vmul.f32 0.999, %v142_v24 }
  0x47   :  { %v80_v26 = vsub.f32 %v73_v23, %v79_v25 }
  0x49   :  { %v81_v27 = vadd.f32 %v156_v14, %v80_v26 }
  0x4b   :  { %vm82_vm3 = vcmp.gt.f32.partialorder %v81_v27, 0.999 }
  0x4c   :  { %v143_v28 = vsel %vm82_vm3, 1.0, %v206_v15 }
  0x4d   :  { %86 = vst [vmem:[#allocation7 + $0x18] sm:$0xff] %v143_v28  ;;  %v87_v29 = vmul.f32 0.999, %v143_v28 }
  0x4f   :  { %v88_v30 = vsub.f32 %v81_v27, %v87_v29 }
  0x51   :  { %v89_v31 = vadd.f32 %v156_v14, %v88_v30 }
  0x53   :  { %vm90_vm4 = vcmp.gt.f32.partialorder %v89_v31, 0.999 }
  0x54   :  { %v144_v32 = vsel %vm90_vm4, 1.0, %v206_v15 }
  0x55   :  { %94 = vst [vmem:[#allocation7 + $0x20] sm:$0xff] %v144_v32  ;;  %v95_v33 = vmul.f32 0.999, %v144_v32 }
  0x57   :  { %v96_v34 = vsub.f32 %v89_v31, %v95_v33 }
  0x59   :  { %v97_v35 = vadd.f32 %v156_v14, %v96_v34 }
  0x5b   :  { %vm98_vm5 = vcmp.gt.f32.partialorder %v97_v35, 0.999 }
  0x5c   :  { %v145_v36 = vsel %vm98_vm5, 1.0, %v206_v15 }
  0x5d   :  { %102 = vst [vmem:[#allocation7 + $0x28] sm:$0xff] %v145_v36  ;;  %v103_v37 = vmul.f32 0.999, %v145_v36 }
  0x5f   :  { %v104_v38 = vsub.f32 %v97_v35, %v103_v37 }
  0x61   :  { %v105_v39 = vadd.f32 %v156_v14, %v104_v38 }
  0x63   :  { %vm106_vm6 = vcmp.gt.f32.partialorder %v105_v39, 0.999 }
  0x64   :  { %v146_v40 = vsel %vm106_vm6, 1.0, %v206_v15 }
  0x65   :  { %110 = vst [vmem:[#allocation7 + $0x30] sm:$0xff] %v146_v40  ;;  %v111_v41 = vmul.f32 0.999, %v146_v40 }
  0x67   :  { %v112_v42 = vsub.f32 %v105_v39, %v111_v41 }
  0x69   :  { %v113_v43 = vadd.f32 %v156_v14, %v112_v42 }
  0x6b   :  { %vm114_vm7 = vcmp.gt.f32.partialorder %v113_v43, 0.999 }
  0x6c   :  { %v147_v44 = vsel %vm114_vm7, 1.0, %v206_v15 }
  0x6d   :  { %118 = vst [vmem:[#allocation7 + $0x38] sm:$0xff] %v147_v44 }
  0x6e   :  { %190 = shalt.err (!%p187_p12)
}
  0x6f   :  { %s191_s30 = scalar_lea.hbm %s263_s3, 1024 }
  0x70   :  { %p192_p13 = scmp.ne.s32.totalorder %s263_s3, %s191_s30  ;;  %p195_p0 = scmp.lt.u32.totalorder %s191_s30, %s263_s3 }
  0x72   :  { %p197_p1 = pnand %p195_p0, %p192_p13 }
  0x74   :  { %200 = shalt.err (!%p197_p1)
}
  0x75   :  { %s208_s8 = smov 128   ;;  %s209_s9 = smov 8  }
  0x76   :  { %133 = dma.vmem_to_hbm [thread:$0]  %s128_s1, 1024, %s263_s3, [#allocation6], %s208_s8, %s208_s8, %s209_s9  }
  0x77   :  { %203 = dma.done.wait [#allocation6], 1024  }
  0x78   :  { %204 = vsyncadd [#allocation6], 4294966272 }
  0x79   :  { %137 = vsyncpa [#allocation5], 1 }
  0x7a   :  { %138 = vsyncpa [#allocation6], 1 }

</bundles_post_ra>
